<compile_context>
chip_gen: v5e
topology: v5e:2x2
jax: 0.10.0
libtpu: 0.0.40
codegen_flags: <defaults>
</compile_context>

<pallas_src>
import jax
import jax.numpy as jnp
from jax.experimental import pallas as pl
from jax.experimental.pallas import tpu as pltpu


def _iclassifier_kernel(x_ref, w_ref, b_ref, c_ref, acc_ref):
    # x_ref: (tn, tk) f32     w_ref: (tk, C_pad) f32   b_ref: (1, C_pad) f32
    # c_ref: (tn, C_pad) f32  acc_ref: (tn, C_pad) f32 scratch
    k = pl.program_id(1)

    @pl.when(k == 0)
    def _():
        acc_ref[...] = jnp.zeros_like(acc_ref)

    acc_ref[...] += jnp.dot(
        x_ref[...], w_ref[...], preferred_element_type=jnp.float32
    )

    @pl.when(k == pl.num_programs(1) - 1)
    def _():
        c_ref[...] = acc_ref[...] + b_ref[...]


def iclassifier_forward(x, weight, bias):
    """Pallas implementation of IClassifier.forward.

    Args:
      x:      any-rank array, leading dim = batch N. Flattened to (N, F).
      weight: (C, F) -- same layout as nn.Linear.weight
      bias:   (C,)   -- same layout as nn.Linear.bias
    Returns:
      (x_flat, c): ((N, F) float32, (N, C) float32)
    """
    xf = x.astype(jnp.float32)  # module does .float() explicitly -> f32 parity
    n = xf.shape[0]
    x_flat = xf.reshape(n, -1)
    f = x_flat.shape[1]
    c = weight.shape[0]

    # ---- tile sizes -------------------------------------------------------
    # Output columns: pad to a multiple of 128 -> lane-dense stores.
    c_pad = pl.cdiv(c, 128) * 128
    # Feature (K) tile: multiple of 128, capped at 2048 so the double-buffered
    # x / W streams stay small regardless of how large F is.
    tk = min(2048, pl.cdiv(f, 128) * 128)
    f_padded = pl.cdiv(f, tk) * tk
    # Batch (row) tile: multiple of 8 sublanes.
    n_pad8 = pl.cdiv(n, 8) * 8
    tn = min(256, n_pad8)
    n_padded = pl.cdiv(n, tn) * tn

    # ---- padded, kernel-friendly operand layouts --------------------------
    # W^T zero-padded to (f_padded, c_pad); zero rows/cols don't change x@W^T.
    w_t = jnp.zeros((f_padded, c_pad), jnp.float32)
    w_t = w_t.at[:f, :c].set(weight.astype(jnp.float32).T)
    b2 = jnp.zeros((1, c_pad), jnp.float32)
    b2 = b2.at[:, :c].set(bias.astype(jnp.float32))

    if (n_padded != n) or (f_padded != f):
        x_in = jnp.pad(x_flat, ((0, n_padded - n), (0, f_padded - f)))
    else:
        x_in = x_flat

    grid = (n_padded // tn, f_padded // tk)

    # Explicit VMEM limit: double-buffered x/W/bias/out tiles + acc + headroom.
    needed = 4 * (
        2 * tn * tk          # x stream
        + 2 * tk * c_pad     # W stream
        + 2 * c_pad          # bias
        + 2 * tn * c_pad     # out stream
        + tn * c_pad         # accumulator scratch
    )
    vmem_limit = int(min(max(needed + (4 << 20), 16 << 20), 48 << 20))

    logits_padded = pl.pallas_call(
        _iclassifier_kernel,
        out_shape=jax.ShapeDtypeStruct((n_padded, c_pad), jnp.float32),
        grid_spec=pltpu.PrefetchScalarGridSpec(
            num_scalar_prefetch=0,
            grid=grid,
            in_specs=[
                pl.BlockSpec((tn, tk), lambda i, k: (i, k)),
                pl.BlockSpec((tk, c_pad), lambda i, k: (k, 0)),
                pl.BlockSpec((1, c_pad), lambda i, k: (0, 0)),
            ],
            out_specs=pl.BlockSpec((tn, c_pad), lambda i, k: (i, 0)),
            scratch_shapes=[pltpu.VMEM((tn, c_pad), jnp.float32)],
        ),
        compiler_params=pltpu.CompilerParams(
            dimension_semantics=("parallel", "arbitrary"),
            vmem_limit_bytes=vmem_limit,
        ),
    )(x_in, w_t, b2)

    logits = logits_padded[:n, :c]
    return x_flat, logits


if __name__ == "__main__":
    # Small deterministic example consistent with the module:
    #   4-D input (2, 4, 16, 16) -> flattened feature_size = 1024, output_class = 4
    key = jax.random.PRNGKey(0)
    k_x, k_w, k_b = jax.random.split(key, 3)

    batch, chans, spatial = 2, 4, 16
    feature_size = chans * spatial * spatial  # 1024 (module default)
    output_class = 4

    x = jax.random.normal(k_x, (batch, chans, spatial, spatial), dtype=jnp.float32)
    weight = jax.random.normal(
        k_w, (output_class, feature_size), dtype=jnp.float32) * 0.02
    bias = jax.random.normal(k_b, (output_class,), dtype=jnp.float32) * 0.02

    feat, logits = iclassifier_forward(x, weight, bias)
    jax.block_until_ready((feat, logits))

    # Reference check (same math as the PyTorch forward).
    ref_feat = x.astype(jnp.float32).reshape(batch, -1)
    ref_logits = ref_feat @ weight.T + bias
    assert feat.shape == (batch, feature_size)
    assert logits.shape == (batch, output_class)
    assert jnp.allclose(feat, ref_feat, atol=1e-5, rtol=1e-5)
    assert jnp.allclose(logits, ref_logits, atol=1e-4, rtol=1e-4)

    print("KERNEL_OK")
</pallas_src>

<mosaic_0001>
module attributes {stable_mosaic.version = 11 : i64} {
  func.func @_iclassifier_kernel(%arg0: i32, %arg1: i32, %arg2: memref<8x1024xf32, #tpu.memory_space<vmem>>, %arg3: memref<1024x128xf32, #tpu.memory_space<vmem>>, %arg4: memref<1x128xf32, #tpu.memory_space<vmem>>, %arg5: memref<8x128xf32, #tpu.memory_space<vmem>>, %arg6: memref<8x128xf32, #tpu.memory_space<vmem>>) attributes {dimension_semantics = [#tpu.dimension_semantics<parallel>, #tpu.dimension_semantics<arbitrary>], iteration_bounds = array<i64: 1, 1>, scalar_prefetch = 0 : i64, scratch_operands = 1 : i64, tpu.core_type = #tpu.core_type<tc>, window_params = [{transform_indices = @transform_0, window_bounds = array<i64: 8, 1024>}, {transform_indices = @transform_1, window_bounds = array<i64: 1024, 128>}, {pipeline_mode = #tpu.pipeline_mode<synchronous>, transform_indices = @transform_2, window_bounds = array<i64: 1, 128>}, {transform_indices = @transform_3, window_bounds = array<i64: 8, 128>}]} {
    %c0_i32 = arith.constant 0 : i32
    %0 = arith.cmpi eq, %arg1, %c0_i32 : i32
    %1 = arith.extui %0 : i1 to i32
    %c0_i32_0 = arith.constant 0 : i32
    %2 = arith.cmpi ne, %1, %c0_i32_0 : i32
    scf.if %2 {
      %cst_10 = arith.constant 0.000000e+00 : f32
      %12 = vector.broadcast %cst_10 : f32 to vector<8x128xf32>
      %c0_11 = arith.constant 0 : index
      %c0_12 = arith.constant 0 : index
      %13 = vector.load %arg6[%c0_11, %c0_12] : memref<8x128xf32, #tpu.memory_space<vmem>>, vector<8x128xf32>
      tpu.vector_store %arg6[%c0_11, %c0_12], %12 {strides = array<i32>} : memref<8x128xf32, #tpu.memory_space<vmem>>, vector<8x128xf32>,
    } else {
    }
    %c0 = arith.constant 0 : index
    %c0_1 = arith.constant 0 : index
    %3 = vector.load %arg6[%c0, %c0_1] : memref<8x128xf32, #tpu.memory_space<vmem>>, vector<8x128xf32>
    %c0_2 = arith.constant 0 : index
    %c0_3 = arith.constant 0 : index
    %4 = vector.load %arg2[%c0_2, %c0_3] : memref<8x1024xf32, #tpu.memory_space<vmem>>, vector<8x1024xf32>
    %c0_4 = arith.constant 0 : index
    %c0_5 = arith.constant 0 : index
    %5 = vector.load %arg3[%c0_4, %c0_5] : memref<1024x128xf32, #tpu.memory_space<vmem>>, vector<1024x128xf32>
    %cst = arith.constant dense<0.000000e+00> : vector<8x128xf32>
    %6 = tpu.matmul %4, %5, %cst {dimension_numbers = #tpu.dot_dimension_numbers<[1], [0], [0], [1], [0, 0, 1, 1], [], []>} : vector<8x1024xf32>, vector<1024x128xf32>, vector<8x128xf32> -> vector<8x128xf32>
    %7 = arith.addf %3, %6 : vector<8x128xf32>
    %c0_6 = arith.constant 0 : index
    %c0_7 = arith.constant 0 : index
    %8 = vector.load %arg6[%c0_6, %c0_7] : memref<8x128xf32, #tpu.memory_space<vmem>>, vector<8x128xf32>
    tpu.vector_store %arg6[%c0_6, %c0_7], %7 {strides = array<i32>} : memref<8x128xf32, #tpu.memory_space<vmem>>, vector<8x128xf32>,
    %c0_i32_8 = arith.constant 0 : i32
    %9 = arith.cmpi eq, %arg1, %c0_i32_8 : i32
    %10 = arith.extui %9 : i1 to i32
    %c0_i32_9 = arith.constant 0 : i32
    %11 = arith.cmpi ne, %10, %c0_i32_9 : i32
    scf.if %11 {
      %c0_10 = arith.constant 0 : index
      %c0_11 = arith.constant 0 : index
      %12 = vector.load %arg6[%c0_10, %c0_11] : memref<8x128xf32, #tpu.memory_space<vmem>>, vector<8x128xf32>
      %c0_12 = arith.constant 0 : index
      %c0_13 = arith.constant 0 : index
      %13 = vector.load %arg4[%c0_12, %c0_13] : memref<1x128xf32, #tpu.memory_space<vmem>>, vector<1x128xf32>
      %14 = vector.broadcast %13 : vector<1x128xf32> to vector<8x128xf32>
      %15 = arith.addf %12, %14 : vector<8x128xf32>
      %c0_14 = arith.constant 0 : index
      %c0_15 = arith.constant 0 : index
      %16 = vector.load %arg5[%c0_14, %c0_15] : memref<8x128xf32, #tpu.memory_space<vmem>>, vector<8x128xf32>
      tpu.vector_store %arg5[%c0_14, %c0_15], %15 {strides = array<i32>} : memref<8x128xf32, #tpu.memory_space<vmem>>, vector<8x128xf32>,
    } else {
    }
    return
  }
  func.func @transform_0(%arg0: i32, %arg1: i32) -> (i32, i32) {
    %c0_i32 = arith.constant 0 : i32
    return %arg0, %arg1 : i32, i32
  }
  func.func @transform_1(%arg0: i32, %arg1: i32) -> (i32, i32) {
    %c0_i32 = arith.constant 0 : i32
    %c0_i32_0 = arith.constant 0 : i32
    return %arg1, %c0_i32 : i32, i32
  }
  func.func @transform_2(%arg0: i32, %arg1: i32) -> (i32, i32) {
    %c0_i32 = arith.constant 0 : i32
    %c0_i32_0 = arith.constant 0 : i32
    %c0_i32_1 = arith.constant 0 : i32
    return %c0_i32, %c0_i32_0 : i32, i32
  }
  func.func @transform_3(%arg0: i32, %arg1: i32) -> (i32, i32) {
    %c0_i32 = arith.constant 0 : i32
    %c0_i32_0 = arith.constant 0 : i32
    return %arg0, %c0_i32 : i32, i32
  }
}

</mosaic_0001>

<bundles_post_ra>
// kernel: tpu_custom_call.1
= control target key start
LH: loop header
LB: loop body
LE: loop exit
PB: predicated region body
PF: predicated region fallthrough
CT: control target
= control target key end

     0   :  { %8 = vsyncpa [#allocation4], 0  ;;  %s498_s0 = inlined_call_operand.hbm [shape: f32[8,1024], index: 0, kind: input, shape index: {}]   ;;  %s499_s1 = inlined_call_operand.hbm [shape: f32[1024,128], index: 1, kind: input, shape index: {}]   ;;  %s500_s2 = inlined_call_operand.vmem [shape: f32[1,128], index: 2, kind: input, shape index: {}]   ;;  %s501_s3 = inlined_call_operand.hbm [shape: f32[8,128], index: 3, kind: output, shape index: {}]  }
   0x1   :  { %9 = vsyncpa [#allocation7], 0 }
   0x2   :  { %10 = vsyncpa [#allocation5], 0  ;;  %s16_s14 = sshll.u32 %s498_s0, 4  ;;  %s461_s15 = smov [#allocation3]   ;;  %s17_s14 = int_to_ptr.hbm [resolvable:$true] %s16_s14 }
   0x3   :  { %s18_s16 = sshll.u32 %s461_s15, 4  ;;  %s26_s19 = sshll.u32 %s499_s1, 4  ;;  %s19_s16 = int_to_ptr.vmem [resolvable:$true] %s18_s16  ;;  %s27_s19 = int_to_ptr.hbm [resolvable:$true] %s26_s19 }
   0x4   :  { %21 = dma.hbm_to_vmem [thread:$0]  %s17_s14, 1024, %s19_s16, [#allocation4]  }
   0x5   :  { %s462_s20 = smov [#allocation6]   ;;  %s463_s22 = smov 128  }
   0x6   :  { %s28_s21 = sshll.u32 %s462_s20, 4  ;;  %s464_s23 = smov 8   ;;  %s29_s21 = int_to_ptr.vmem [resolvable:$true] %s28_s21 }
   0x7   :  { %34 = dma.hbm_to_vmem [thread:$0]  %s27_s19, 16384, %s29_s21, [#allocation7], %s463_s22, %s463_s22, %s464_s23  }
   0x8   :  { %455 = dma.done.wait [#allocation4], 1024  }
   0x9   :  { %456 = vsyncadd [#allocation4], 4294966272 }
   0xa   :  { %457 = dma.done.wait [#allocation7], 16384  }
   0xb   :  { %458 = vsyncadd [#allocation7], 4294950912  ;;  %v74_v0 = vld [vmem:[#allocation6 + $0x78] sm:$0xff]  ;;  %v73_v2 = vld [vmem:[#allocation6 + $0x70] sm:$0xff]  ;;  %s465_s24 = smov [#allocation8]   ;;  %s366_s28 = sshll.u32 %s501_s3, 4  ;;  %s367_s28 = int_to_ptr.hbm [resolvable:$true] %s366_s28 }
   0xc   :  { %v106_v1 = vld [vmem:[#allocation6 + $0x178] sm:$0xff]  ;;  %187 = vmatpush.msra.mxu0 %v74_v0  ;;  %v105_v4 = vld [vmem:[#allocation6 + $0x170] sm:$0xff]  ;;  %v72_v6 = vld [vmem:[#allocation6 + $0x68] sm:$0xff]  ;;  %s364_s25 = sshll.u32 %s465_s24, 4  ;;  %s365_s25 = int_to_ptr.vmem [resolvable:$true] %s364_s25 }
   0xd   :  { %227 = vmatpush.msra.mxu2 %v106_v1  ;;  %v90_v3 = vld [vmem:[#allocation6 + $0xf8] sm:$0xff]  ;;  %v89_v7 = vld [vmem:[#allocation6 + $0xf0] sm:$0xff]  ;;  %v104_v8 = vld [vmem:[#allocation6 + $0x168] sm:$0xff] }
   0xe   :  { %v122_v5 = vld [vmem:[#allocation6 + $0x1f8] sm:$0xff]  ;;  %207 = vmatpush.msra.mxu1 %v90_v3  ;;  %188 = vmatpush.msra.mxu0 %v73_v2  ;;  %v121_v9 = vld [vmem:[#allocation6 + $0x1f0] sm:$0xff]  ;;  %v88_v10 = vld [vmem:[#allocation6 + $0xe8] sm:$0xff] }
   0xf   :  { %247 = vmatpush.msra.mxu3 %v122_v5  ;;  %228 = vmatpush.msra.mxu2 %v105_v4  ;;  %v71_v11 = vld [vmem:[#allocation6 + $0x60] sm:$0xff]  ;;  %v120_v13 = vld [vmem:[#allocation6 + $0x1e8] sm:$0xff]  ;;  %v70_v16 = vld [vmem:[#allocation6 + $0x58] sm:$0xff] }
  0x10   :  { %208 = vmatpush.msra.mxu1 %v89_v7  ;;  %v103_v12 = vld [vmem:[#allocation6 + $0x160] sm:$0xff]  ;;  %189 = vmatpush.msra.mxu0 %v72_v6  ;;  %v102_v17 = vld [vmem:[#allocation6 + $0x158] sm:$0xff]  ;;  %v69_v20 = vld [vmem:[#allocation6 + $0x50] sm:$0xff] }
  0x11   :  { %248 = vmatpush.msra.mxu3 %v121_v9  ;;  %229 = vmatpush.msra.mxu2 %v104_v8  ;;  %v87_v14 = vld [vmem:[#allocation6 + $0xe0] sm:$0xff]  ;;  %v86_v18 = vld [vmem:[#allocation6 + $0xd8] sm:$0xff]  ;;  %v101_v21 = vld [vmem:[#allocation6 + $0x150] sm:$0xff] }
  0x12   :  { %v119_v15 = vld [vmem:[#allocation6 + $0x1e0] sm:$0xff]  ;;  %209 = vmatpush.msra.mxu1 %v88_v10  ;;  %190 = vmatpush.msra.mxu0 %v71_v11  ;;  %v118_v19 = vld [vmem:[#allocation6 + $0x1d8] sm:$0xff]  ;;  %v85_v22 = vld [vmem:[#allocation6 + $0xd0] sm:$0xff] }
  0x13   :  { %249 = vmatpush.msra.mxu3 %v120_v13  ;;  %230 = vmatpush.msra.mxu2 %v103_v12  ;;  %v117_v23 = vld [vmem:[#allocation6 + $0x1d0] sm:$0xff]  ;;  %v68_v24 = vld [vmem:[#allocation6 + $0x48] sm:$0xff]  ;;  %v67_v28 = vld [vmem:[#allocation6 + $0x40] sm:$0xff] }
  0x14   :  { %210 = vmatpush.msra.mxu1 %v87_v14  ;;  %191 = vmatpush.msra.mxu0 %v70_v16  ;;  %v100_v25 = vld [vmem:[#allocation6 + $0x148] sm:$0xff]  ;;  %v99_v29 = vld [vmem:[#allocation6 + $0x140] sm:$0xff]  ;;  %v66_v32 = vld [vmem:[#allocation6 + $0x38] sm:$0xff] }
  0x15   :  { %250 = vmatpush.msra.mxu3 %v119_v15  ;;  %231 = vmatpush.msra.mxu2 %v102_v17  ;;  %v84_v26 = vld [vmem:[#allocation6 + $0xc8] sm:$0xff]  ;;  %v83_v30 = vld [vmem:[#allocation6 + $0xc0] sm:$0xff]  ;;  %v98_v33 = vld [vmem:[#allocation6 + $0x138] sm:$0xff] }
  0x16   :  { %211 = vmatpush.msra.mxu1 %v86_v18  ;;  %192 = vmatpush.msra.mxu0 %v69_v20  ;;  %v116_v27 = vld [vmem:[#allocation6 + $0x1c8] sm:$0xff]  ;;  %v115_v31 = vld [vmem:[#allocation6 + $0x1c0] sm:$0xff]  ;;  %v82_v34 = vld [vmem:[#allocation6 + $0xb8] sm:$0xff] }
  0x17   :  { %251 = vmatpush.msra.mxu3 %v118_v19  ;;  %232 = vmatpush.msra.mxu2 %v101_v21  ;;  %v114_v35 = vld [vmem:[#allocation6 + $0x1b8] sm:$0xff]  ;;  %v65_v36 = vld [vmem:[#allocation6 + $0x30] sm:$0xff]  ;;  %v64_v40 = vld [vmem:[#allocation6 + $0x28] sm:$0xff] }
  0x18   :  { %212 = vmatpush.msra.mxu1 %v85_v22  ;;  %193 = vmatpush.msra.mxu0 %v68_v24  ;;  %v97_v37 = vld [vmem:[#allocation6 + $0x130] sm:$0xff]  ;;  %v96_v41 = vld [vmem:[#allocation6 + $0x128] sm:$0xff]  ;;  %v63_v44 = vld [vmem:[#allocation6 + $0x20] sm:$0xff] }
  0x19   :  { %252 = vmatpush.msra.mxu3 %v117_v23  ;;  %233 = vmatpush.msra.mxu2 %v100_v25  ;;  %v81_v38 = vld [vmem:[#allocation6 + $0xb0] sm:$0xff]  ;;  %v80_v42 = vld [vmem:[#allocation6 + $0xa8] sm:$0xff]  ;;  %v95_v45 = vld [vmem:[#allocation6 + $0x120] sm:$0xff] }
  0x1a   :  { %213 = vmatpush.msra.mxu1 %v84_v26  ;;  %194 = vmatpush.msra.mxu0 %v67_v28  ;;  %v113_v39 = vld [vmem:[#allocation6 + $0x1b0] sm:$0xff]  ;;  %v112_v43 = vld [vmem:[#allocation6 + $0x1a8] sm:$0xff]  ;;  %v79_v46 = vld [vmem:[#allocation6 + $0xa0] sm:$0xff] }
  0x1b   :  { %253 = vmatpush.msra.mxu3 %v116_v27  ;;  %234 = vmatpush.msra.mxu2 %v99_v29  ;;  %v111_v47 = vld [vmem:[#allocation6 + $0x1a0] sm:$0xff]  ;;  %v62_v48 = vld [vmem:[#allocation6 + $0x18] sm:$0xff]  ;;  %v61_v52 = vld [vmem:[#allocation6 + $0x10] sm:$0xff] }
  0x1c   :  { %214 = vmatpush.msra.mxu1 %v83_v30  ;;  %195 = vmatpush.msra.mxu0 %v66_v32  ;;  %v94_v49 = vld [vmem:[#allocation6 + $0x118] sm:$0xff]  ;;  %v93_v53 = vld [vmem:[#allocation6 + $0x110] sm:$0xff]  ;;  %v60_v56 = vld [vmem:[#allocation6 + $0x8] sm:$0xff] }
  0x1d   :  { %254 = vmatpush.msra.mxu3 %v115_v31  ;;  %235 = vmatpush.msra.mxu2 %v98_v33  ;;  %v78_v50 = vld [vmem:[#allocation6 + $0x98] sm:$0xff]  ;;  %v77_v54 = vld [vmem:[#allocation6 + $0x90] sm:$0xff]  ;;  %v92_v57 = vld [vmem:[#allocation6 + $0x108] sm:$0xff] }
  0x1e   :  { %215 = vmatpush.msra.mxu1 %v82_v34  ;;  %196 = vmatpush.msra.mxu0 %v65_v36  ;;  %v110_v51 = vld [vmem:[#allocation6 + $0x198] sm:$0xff]  ;;  %v109_v55 = vld [vmem:[#allocation6 + $0x190] sm:$0xff]  ;;  %v76_v58 = vld [vmem:[#allocation6 + $0x88] sm:$0xff] }
  0x1f   :  { %255 = vmatpush.msra.mxu3 %v114_v35  ;;  %236 = vmatpush.msra.mxu2 %v97_v37  ;;  %v108_v59 = vld [vmem:[#allocation6 + $0x188] sm:$0xff]  ;;  %v59_v60 = vld [vmem:[#allocation6] sm:$0xff]  ;;  %v138_v62 = vld [vmem:[#allocation6 + $0x278] sm:$0xff] }
  0x20   :  { %216 = vmatpush.msra.mxu1 %v81_v38  ;;  %197 = vmatpush.msra.mxu0 %v64_v40  ;;  %v91_v61 = vld [vmem:[#allocation6 + $0x100] sm:$0xff]  ;;  %v170_v63 = vld [vmem:[#allocation6 + $0x378] sm:$0xff]  ;;  %v137_v2 = vld [vmem:[#allocation6 + $0x270] sm:$0xff] }
  0x21   :  { %256 = vmatpush.msra.mxu3 %v113_v39  ;;  %237 = vmatpush.msra.mxu2 %v96_v41  ;;  %v75_v0 = vld [vmem:[#allocation6 + $0x80] sm:$0xff]  ;;  %v154_v3 = vld [vmem:[#allocation6 + $0x2f8] sm:$0xff]  ;;  %v169_v4 = vld [vmem:[#allocation6 + $0x370] sm:$0xff] }
  0x22   :  { %217 = vmatpush.msra.mxu1 %v80_v42  ;;  %198 = vmatpush.msra.mxu0 %v63_v44  ;;  %v107_v1 = vld [vmem:[#allocation6 + $0x180] sm:$0xff]  ;;  %v186_v5 = vld [vmem:[#allocation6 + $0x3f8] sm:$0xff]  ;;  %v136_v6 = vld [vmem:[#allocation6 + $0x268] sm:$0xff] }
  0x23   :  { %257 = vmatpush.msra.mxu3 %v112_v43  ;;  %238 = vmatpush.msra.mxu2 %v95_v45  ;;  %v153_v7 = vld [vmem:[#allocation6 + $0x2f0] sm:$0xff]  ;;  %v168_v8 = vld [vmem:[#allocation6 + $0x368] sm:$0xff]  ;;  %v135_v10 = vld [vmem:[#allocation6 + $0x260] sm:$0xff] }
  0x24   :  { %218 = vmatpush.msra.mxu1 %v79_v46  ;;  %199 = vmatpush.msra.mxu0 %v62_v48  ;;  %v185_v9 = vld [vmem:[#allocation6 + $0x3f0] sm:$0xff]  ;;  %v152_v11 = vld [vmem:[#allocation6 + $0x2e8] sm:$0xff]  ;;  %v167_v12 = vld [vmem:[#allocation6 + $0x360] sm:$0xff] }
  0x25   :  { %258 = vmatpush.msra.mxu3 %v111_v47  ;;  %239 = vmatpush.msra.mxu2 %v94_v49  ;;  %v184_v13 = vld [vmem:[#allocation6 + $0x3e8] sm:$0xff]  ;;  %v134_v14 = vld [vmem:[#allocation6 + $0x258] sm:$0xff]  ;;  %v151_v15 = vld [vmem:[#allocation6 + $0x2e0] sm:$0xff] }
  0x26   :  { %219 = vmatpush.msra.mxu1 %v78_v50  ;;  %200 = vmatpush.msra.mxu0 %v61_v52  ;;  %v166_v16 = vld [vmem:[#allocation6 + $0x358] sm:$0xff]  ;;  %v183_v17 = vld [vmem:[#allocation6 + $0x3e0] sm:$0xff]  ;;  %v133_v18 = vld [vmem:[#allocation6 + $0x250] sm:$0xff] }
  0x27   :  { %259 = vmatpush.msra.mxu3 %v110_v51  ;;  %240 = vmatpush.msra.mxu2 %v93_v53  ;;  %v150_v19 = vld [vmem:[#allocation6 + $0x2d8] sm:$0xff]  ;;  %v165_v20 = vld [vmem:[#allocation6 + $0x350] sm:$0xff]  ;;  %v132_v22 = vld [vmem:[#allocation6 + $0x248] sm:$0xff] }
  0x28   :  { %220 = vmatpush.msra.mxu1 %v77_v54  ;;  %201 = vmatpush.msra.mxu0 %v60_v56  ;;  %v182_v21 = vld [vmem:[#allocation6 + $0x3d8] sm:$0xff]  ;;  %v149_v23 = vld [vmem:[#allocation6 + $0x2d0] sm:$0xff]  ;;  %v164_v24 = vld [vmem:[#allocation6 + $0x348] sm:$0xff] }
  0x29   :  { %260 = vmatpush.msra.mxu3 %v109_v55  ;;  %241 = vmatpush.msra.mxu2 %v92_v57  ;;  %v181_v25 = vld [vmem:[#allocation6 + $0x3d0] sm:$0xff]  ;;  %v131_v26 = vld [vmem:[#allocation6 + $0x240] sm:$0xff]  ;;  %v148_v27 = vld [vmem:[#allocation6 + $0x2c8] sm:$0xff] }
  0x2a   :  { %221 = vmatpush.msra.mxu1 %v76_v58  ;;  %202 = vmatpush.msra.mxu0 %v59_v60  ;;  %v163_v28 = vld [vmem:[#allocation6 + $0x340] sm:$0xff]  ;;  %v180_v29 = vld [vmem:[#allocation6 + $0x3c8] sm:$0xff]  ;;  %v130_v30 = vld [vmem:[#allocation6 + $0x238] sm:$0xff] }
  0x2b   :  { %261 = vmatpush.msra.mxu3 %v108_v59  ;;  %242 = vmatpush.msra.mxu2 %v91_v61  ;;  %v147_v31 = vld [vmem:[#allocation6 + $0x2c0] sm:$0xff]  ;;  %v162_v32 = vld [vmem:[#allocation6 + $0x338] sm:$0xff]  ;;  %v129_v34 = vld [vmem:[#allocation6 + $0x230] sm:$0xff] }
  0x2c   :  { %267 = vmatpush.msrb.mxu0 %v138_v62  ;;  %222 = vmatpush.msra.mxu1 %v75_v0  ;;  %v179_v33 = vld [vmem:[#allocation6 + $0x3c0] sm:$0xff]  ;;  %v146_v35 = vld [vmem:[#allocation6 + $0x2b8] sm:$0xff]  ;;  %v161_v36 = vld [vmem:[#allocation6 + $0x330] sm:$0xff] }
  0x2d   :  { %307 = vmatpush.msrb.mxu2 %v170_v63  ;;  %262 = vmatpush.msra.mxu3 %v107_v1  ;;  %v178_v37 = vld [vmem:[#allocation6 + $0x3b8] sm:$0xff]  ;;  %v128_v38 = vld [vmem:[#allocation6 + $0x228] sm:$0xff]  ;;  %v145_v39 = vld [vmem:[#allocation6 + $0x2b0] sm:$0xff] }
  0x2e   :  { %268 = vmatpush.msrb.mxu0 %v137_v2  ;;  %287 = vmatpush.msrb.mxu1 %v154_v3  ;;  %v160_v40 = vld [vmem:[#allocation6 + $0x328] sm:$0xff]  ;;  %v177_v41 = vld [vmem:[#allocation6 + $0x3b0] sm:$0xff]  ;;  %v127_v43 = vld [vmem:[#allocation6 + $0x220] sm:$0xff] }
  0x2f   :  { %308 = vmatpush.msrb.mxu2 %v169_v4  ;;  %327 = vmatpush.msrb.mxu3 %v186_v5  ;;  %v53_v42 = vld [vmem:[#allocation3 + $0x10] sm:$0xff]  ;;  %v144_v44 = vld [vmem:[#allocation6 + $0x2a8] sm:$0xff]  ;;  %v159_v45 = vld [vmem:[#allocation6 + $0x320] sm:$0xff] }
  0x30   :  { %269 = vmatpush.msrb.mxu0 %v136_v6  ;;  %288 = vmatpush.msrb.mxu1 %v153_v7  ;;  %v176_v46 = vld [vmem:[#allocation6 + $0x3a8] sm:$0xff]  ;;  %v51_v47 = vld [vmem:[#allocation3] sm:$0xff]  ;;  %v54_v48 = vld [vmem:[#allocation3 + $0x18] sm:$0xff] }
  0x31   :  { %309 = vmatpush.msrb.mxu2 %v168_v8  ;;  %328 = vmatpush.msrb.mxu3 %v185_v9  ;;  %v126_v49 = vld [vmem:[#allocation6 + $0x218] sm:$0xff]  ;;  %v143_v50 = vld [vmem:[#allocation6 + $0x2a0] sm:$0xff]  ;;  %v52_v53 = vld [vmem:[#allocation3 + $0x8] sm:$0xff] }
  0x32   :  { %270 = vmatpush.msrb.mxu0 %v135_v10  ;;  %289 = vmatpush.msrb.mxu1 %v152_v11  ;;  %v158_v51 = vld [vmem:[#allocation6 + $0x318] sm:$0xff]  ;;  %v175_v52 = vld [vmem:[#allocation6 + $0x3a0] sm:$0xff]  ;;  %v125_v54 = vld [vmem:[#allocation6 + $0x210] sm:$0xff] }
  0x33   :  { %310 = vmatpush.msrb.mxu2 %v167_v12  ;;  %329 = vmatpush.msrb.mxu3 %v184_v13  ;;  %v142_v55 = vld [vmem:[#allocation6 + $0x298] sm:$0xff]  ;;  %v157_v56 = vld [vmem:[#allocation6 + $0x310] sm:$0xff]  ;;  %v124_v58 = vld [vmem:[#allocation6 + $0x208] sm:$0xff] }
  0x34   :  { %271 = vmatpush.msrb.mxu0 %v134_v14  ;;  %290 = vmatpush.msrb.mxu1 %v151_v15  ;;  %v174_v57 = vld [vmem:[#allocation6 + $0x398] sm:$0xff]  ;;  %v141_v59 = vld [vmem:[#allocation6 + $0x290] sm:$0xff]  ;;  %v156_v60 = vld [vmem:[#allocation6 + $0x308] sm:$0xff] }
  0x35   :  { %311 = vmatpush.msrb.mxu2 %v166_v16  ;;  %330 = vmatpush.msrb.mxu3 %v183_v17  ;;  %v173_v61 = vld [vmem:[#allocation6 + $0x390] sm:$0xff]  ;;  %v123_v62 = vld [vmem:[#allocation6 + $0x200] sm:$0xff]  ;;  %v140_v63 = vld [vmem:[#allocation6 + $0x288] sm:$0xff] }
  0x36   :  { %272 = vmatpush.msrb.mxu0 %v133_v18  ;;  %291 = vmatpush.msrb.mxu1 %v150_v19  ;;  %v155_v0 = vld [vmem:[#allocation6 + $0x300] sm:$0xff]  ;;  %v172_v1 = vld [vmem:[#allocation6 + $0x388] sm:$0xff]  ;;  %v57_v3 = vld [vmem:[#allocation3 + $0x30] sm:$0xff] }
  0x37   :  { %312 = vmatpush.msrb.mxu2 %v165_v20  ;;  %331 = vmatpush.msrb.mxu3 %v182_v21  ;;  %v55_v2 = vld [vmem:[#allocation3 + $0x20] sm:$0xff]  ;;  %v56_v6 = vld [vmem:[#allocation3 + $0x28] sm:$0xff]  ;;  %v58_v7 = vld [vmem:[#allocation3 + $0x38] sm:$0xff] }
  0x38   :  { %273 = vmatpush.msrb.mxu0 %v132_v22  ;;  %292 = vmatpush.msrb.mxu1 %v149_v23  ;;  %v139_v4 = vld [vmem:[#allocation6 + $0x280] sm:$0xff] }
  0x39   :  { %313 = vmatpush.msrb.mxu2 %v164_v24  ;;  %332 = vmatpush.msrb.mxu3 %v181_v25  ;;  %v171_v5 = vld [vmem:[#allocation6 + $0x380] sm:$0xff] }
  0x3a   :  { %274 = vmatpush.msrb.mxu0 %v131_v26  ;;  %293 = vmatpush.msrb.mxu1 %v148_v27  ;;  %v382_v21 = vld [vmem:[%s500_s2] ss:$0 sm:$0xff] }
  0x3b   :  { %314 = vmatpush.msrb.mxu2 %v163_v28  ;;  %333 = vmatpush.msrb.mxu3 %v180_v29 }
  0x3c   :  { %275 = vmatpush.msrb.mxu0 %v130_v30  ;;  %294 = vmatpush.msrb.mxu1 %v147_v31 }
  0x3d   :  { %315 = vmatpush.msrb.mxu2 %v162_v32  ;;  %334 = vmatpush.msrb.mxu3 %v179_v33 }
  0x3e   :  { %276 = vmatpush.msrb.mxu0 %v129_v34  ;;  %295 = vmatpush.msrb.mxu1 %v146_v35 }
  0x3f   :  { %316 = vmatpush.msrb.mxu2 %v161_v36  ;;  %335 = vmatpush.msrb.mxu3 %v178_v37 }
  0x40   :  { %277 = vmatpush.msrb.mxu0 %v128_v38  ;;  %296 = vmatpush.msrb.mxu1 %v145_v39 }
  0x41   :  { %317 = vmatpush.msrb.mxu2 %v160_v40  ;;  %336 = vmatpush.msrb.mxu3 %v177_v41 }
  0x42   :  { %243 = vmatmul.f32.vlgmr.msra.gmra.mxu2 %v53_v42  ;;  %278 = vmatpush.msrb.mxu0 %v127_v43 }
  0x43   :  { %297 = vmatpush.msrb.mxu1 %v144_v44  ;;  %318 = vmatpush.msrb.mxu2 %v159_v45 }
  0x44   :  { %337 = vmatpush.msrb.mxu3 %v176_v46  ;;  %203 = vmatmul.f32.vlgmr.msra.gmra.mxu0 %v51_v47 }
  0x45   :  { %263 = vmatmul.f32.vlgmr.msra.gmra.mxu3 %v54_v48  ;;  %279 = vmatpush.msrb.mxu0 %v126_v49 }
  0x46   :  { %298 = vmatpush.msrb.mxu1 %v143_v50  ;;  %319 = vmatpush.msrb.mxu2 %v158_v51 }
  0x47   :  { %338 = vmatpush.msrb.mxu3 %v175_v52  ;;  %223 = vmatmul.f32.vlgmr.msra.gmra.mxu1 %v52_v53 }
  0x48   :  { %280 = vmatpush.msrb.mxu0 %v125_v54  ;;  %299 = vmatpush.msrb.mxu1 %v142_v55 }
  0x49   :  { %320 = vmatpush.msrb.mxu2 %v157_v56  ;;  %339 = vmatpush.msrb.mxu3 %v174_v57 }
  0x4a   :  { %281 = vmatpush.msrb.mxu0 %v124_v58  ;;  %300 = vmatpush.msrb.mxu1 %v141_v59 }
  0x4b   :  { %321 = vmatpush.msrb.mxu2 %v156_v60  ;;  %340 = vmatpush.msrb.mxu3 %v173_v61 }
  0x4c   :  { %282 = vmatpush.msrb.mxu0 %v123_v62  ;;  %301 = vmatpush.msrb.mxu1 %v140_v63 }
  0x4d   :  { %322 = vmatpush.msrb.mxu2 %v155_v0  ;;  %341 = vmatpush.msrb.mxu3 %v172_v1 }
  0x4e   :  { %283 = vmatmul.f32.vlgmr.msrb.gmra.mxu0 %v55_v2  ;;  %323 = vmatmul.f32.vlgmr.msrb.gmra.mxu2 %v57_v3 }
  0x4f   :  { %302 = vmatpush.msrb.mxu1 %v139_v4  ;;  %342 = vmatpush.msrb.mxu3 %v171_v5 }
  0x50   :  { %303 = vmatmul.f32.vlgmr.msrb.gmra.mxu1 %v56_v6  ;;  %343 = vmatmul.f32.vlgmr.msrb.gmra.mxu3 %v58_v7 }
  0xc1   :  { %v204_v8 = vpop.f32.mrf.mxu0 }
  0xc4   :  { %v224_v9 = vpop.f32.mrf.mxu1 }
  0xc5   :  { %v225_v10 = vadd.f32 %v224_v9, %v204_v8  ;;  %v244_v11 = vpop.f32.mrf.mxu2 }
  0xc7   :  { %v245_v12 = vadd.f32 %v244_v11, %v225_v10 }
  0xc8   :  { %v264_v13 = vpop.f32.mrf.mxu3 }
  0xc9   :  { %v265_v14 = vadd.f32 %v264_v13, %v245_v12 }
  0xcb   :  { %v284_v15 = vpop.f32.mrf.mxu0 }
  0xcc   :  { %v285_v16 = vadd.f32 %v284_v15, %v265_v14 }
  0xcd   :  { %v304_v17 = vpop.f32.mrf.mxu1 }
  0xce   :  { %v305_v18 = vadd.f32 %v304_v17, %v285_v16 }
  0xd1   :  { %v324_v19 = vpop.f32.mrf.mxu2 }
  0xd2   :  { %v325_v20 = vadd.f32 %v324_v19, %v305_v18 }
  0xd3   :  { %v344_v22 = vpop.f32.mrf.mxu3 }
  0xd4   :  { %v345_v23 = vadd.f32 %v344_v22, %v325_v20 }
  0xd6   :  { %v357_v24 = vadd.f32 %v382_v21, %v345_v23 }
  0xd8   :  { %358 = vst [vmem:[#allocation8] sm:$0xff] %v357_v24 }
  0xd9   :  { %369 = dma.vmem_to_hbm [thread:$0]  %s365_s25, 128, %s367_s28, [#allocation5]  }
  0xda   :  { %459 = dma.done.wait [#allocation5], 128  }
  0xdb   :  { %460 = vsyncadd [#allocation5], 4294967168 }
  0xdc   :  { %374 = vsyncpa [#allocation4], 1 }
  0xdd   :  { %375 = vsyncpa [#allocation7], 1 }
  0xde   :  { %376 = vsyncpa [#allocation5], 1 }

</bundles_post_ra>
